<compile_context>
chip_gen: v7x
topology: tpu7x:2x2x1
jax: 0.10.0
libtpu: 0.0.40
codegen_flags: <defaults>
</compile_context>

<pallas_src>
import functools

import jax
import jax.numpy as jnp
from jax.experimental import pallas as pl
from jax.experimental.pallas import tpu as pltpu


def _round_up(x, m):
    return (x + m - 1) // m * m


def _pad2(a, rows, cols):
    r, c = a.shape
    return jnp.pad(a, ((0, rows - r), (0, cols - c)))


def _actor_kernel(x_ref, w1_ref, b1_ref, w2_ref, b2_ref, w3_ref, b3_ref,
                  o_ref, *, action_bound):
    """Full 3-layer MLP for one batch tile, entirely in VMEM.

    Weights are bf16; matmuls accumulate in f32, bias add / ReLU / tanh stay
    in f32.
    """
    x = x_ref[...].astype(jnp.bfloat16)
    h1 = jnp.dot(x, w1_ref[...], preferred_element_type=jnp.float32) + b1_ref[...]
    h1 = jnp.maximum(h1, 0.0).astype(jnp.bfloat16)
    h2 = jnp.dot(h1, w2_ref[...], preferred_element_type=jnp.float32) + b2_ref[...]
    h2 = jnp.maximum(h2, 0.0).astype(jnp.bfloat16)
    h3 = jnp.dot(h2, w3_ref[...], preferred_element_type=jnp.float32) + b3_ref[...]
    o_ref[...] = (action_bound * jnp.tanh(h3)).astype(o_ref.dtype)


def actor_ddpg_forward(state, params, action_bound, *, batch_tile=None):
    """Pallas forward pass of Actor_DDPG.

    state:  (B, state_space) float32
    params: dict with w1 (S,400), b1 (1,400), w2 (400,300), b2 (1,300),
            w3 (300,A), b3 (1,A)  -- all float32, (in, out) layout.
    """
    B, S = state.shape
    H1 = params["w1"].shape[1]
    H2 = params["w2"].shape[1]
    A = params["w3"].shape[1]

    # Lane-dense padded dims (multiples of 128 on the lane axis).
    H1p = _round_up(H1, 128)   # 400 -> 512
    H2p = _round_up(H2, 128)   # 300 -> 384
    Ap = _round_up(A, 128)     # e.g. 4 -> 128

    # Pad + cast weights to bf16 (zero padding is exact); biases stay f32.
    # These are tiny (<0.5 MiB total) so per-call padding is negligible; it
    # also fuses away under jit.
    w1 = _pad2(params["w1"], S, H1p).astype(jnp.bfloat16)
    w2 = _pad2(params["w2"], H1p, H2p).astype(jnp.bfloat16)
    w3 = _pad2(params["w3"], H2p, Ap).astype(jnp.bfloat16)
    b1 = _pad2(params["b1"], 1, H1p)
    b2 = _pad2(params["b2"], 1, H2p)
    b3 = _pad2(params["b3"], 1, Ap)

    # Batch tiling: full batch when small, else 512-row tiles (multiple of 8).
    if batch_tile is None:
        tb = B if B <= 512 else 512
    else:
        tb = batch_tile
    assert tb == B or tb % 8 == 0, (
        "batch_tile must be a multiple of 8 (f32 sublane) when tiling the batch")
    Bp = _round_up(B, tb)
    x_in = state if Bp == B else jnp.pad(state, ((0, Bp - B), (0, 0)))

    kernel = functools.partial(_actor_kernel, action_bound=float(action_bound))

    # Weights / biases: constant index_map -> DMA'd once, kept resident,
    # single-buffered (no wasted VMEM on a second buffer that never changes).
    const = lambda i: (0, 0)
    single = pl.Buffered(1)

    grid_spec = pltpu.PrefetchScalarGridSpec(
        num_scalar_prefetch=0,
        grid=(Bp // tb,),
        in_specs=[
            pl.BlockSpec((tb, S), lambda i: (i, 0)),
            pl.BlockSpec((S, H1p), const, pipeline_mode=single),
            pl.BlockSpec((1, H1p), const, pipeline_mode=single),
            pl.BlockSpec((H1p, H2p), const, pipeline_mode=single),
            pl.BlockSpec((1, H2p), const, pipeline_mode=single),
            pl.BlockSpec((H2p, Ap), const, pipeline_mode=single),
            pl.BlockSpec((1, Ap), const, pipeline_mode=single),
        ],
        out_specs=pl.BlockSpec((tb, Ap), lambda i: (i, 0)),
    )

    cost = pl.CostEstimate(
        flops=2 * Bp * (S * H1p + H1p * H2p + H2p * Ap),
        transcendentals=Bp * Ap,
        bytes_accessed=(Bp * S * 4
                        + (w1.size + w2.size + w3.size) * 2
                        + (b1.size + b2.size + b3.size) * 4
                        + Bp * Ap * 4),
    )

    out_padded = pl.pallas_call(
        kernel,
        out_shape=jax.ShapeDtypeStruct((Bp, Ap), jnp.float32),
        grid_spec=grid_spec,
        compiler_params=pltpu.CompilerParams(
            dimension_semantics=("parallel",),
            vmem_limit_bytes=32 * 1024 * 1024),
        cost_estimate=cost,
    )(x_in, w1, b1, w2, b2, w3, b3)

    return out_padded[:B, :A]


def init_actor_params(key, state_space, action_space):
    """Deterministic init matching nn.Linear default: U(-1/sqrt(fan_in), +...)."""
    def linear(k, fan_in, fan_out):
        kw, kb = jax.random.split(k)
        bound = 1.0 / jnp.sqrt(jnp.float32(fan_in))
        w = jax.random.uniform(kw, (fan_in, fan_out), jnp.float32, -bound, bound)
        b = jax.random.uniform(kb, (1, fan_out), jnp.float32, -bound, bound)
        return w, b

    k1, k2, k3 = jax.random.split(key, 3)
    w1, b1 = linear(k1, state_space, 400)
    w2, b2 = linear(k2, 400, 300)
    w3, b3 = linear(k3, 300, action_space)
    return {"w1": w1, "b1": b1, "w2": w2, "b2": b2, "w3": w3, "b3": b3}


def actor_ref(state, params, action_bound):
    """Pure-JAX f32 reference (matches the PyTorch module exactly)."""
    h1 = jnp.maximum(state @ params["w1"] + params["b1"], 0.0)
    h2 = jnp.maximum(h1 @ params["w2"] + params["b2"], 0.0)
    return action_bound * jnp.tanh(h2 @ params["w3"] + params["b3"])


def actor_ref_bf16(state, params, action_bound):
    """Reference emulating the kernel's bf16-input / f32-accumulate math."""
    w1 = params["w1"].astype(jnp.bfloat16)
    w2 = params["w2"].astype(jnp.bfloat16)
    w3 = params["w3"].astype(jnp.bfloat16)
    x = state.astype(jnp.bfloat16)
    h1 = jnp.dot(x, w1, preferred_element_type=jnp.float32) + params["b1"]
    h1 = jnp.maximum(h1, 0.0).astype(jnp.bfloat16)
    h2 = jnp.dot(h1, w2, preferred_element_type=jnp.float32) + params["b2"]
    h2 = jnp.maximum(h2, 0.0).astype(jnp.bfloat16)
    h3 = jnp.dot(h2, w3, preferred_element_type=jnp.float32) + params["b3"]
    return action_bound * jnp.tanh(h3)


if __name__ == "__main__":
    key = jax.random.PRNGKey(0)
    kp, kx = jax.random.split(key)

    batch = 8
    state_space = 16
    action_space = 4
    action_bound = 2.0

    params = init_actor_params(kp, state_space, action_space)
    state = jax.random.normal(kx, (batch, state_space), jnp.float32)

    fwd = jax.jit(functools.partial(actor_ddpg_forward, action_bound=action_bound))
    out = jax.block_until_ready(fwd(state, params))

    ref_b = jax.block_until_ready(actor_ref_bf16(state, params, action_bound))
    ref_f = jax.block_until_ready(actor_ref(state, params, action_bound))

    assert out.shape == (batch, action_space)
    # Tight check vs the bf16-emulating reference (same math as the kernel).
    assert jnp.allclose(out, ref_b, atol=1e-3, rtol=1e-3), "mismatch vs bf16 reference"
    # Loose sanity check vs the exact f32 PyTorch-equivalent reference.
    assert jnp.allclose(out, ref_f, atol=5e-2, rtol=5e-2), "mismatch vs f32 reference"

    print("KERNEL_OK")
</pallas_src>

<mosaic_0001>
module attributes {stable_mosaic.version = 11 : i64} {
  func.func @_actor_kernel(%arg0: i32, %arg1: memref<8x16xf32, #tpu.memory_space<vmem>>, %arg2: memref<16x512xbf16, #tpu.memory_space<vmem>>, %arg3: memref<1x512xf32, #tpu.memory_space<vmem>>, %arg4: memref<512x384xbf16, #tpu.memory_space<vmem>>, %arg5: memref<1x384xf32, #tpu.memory_space<vmem>>, %arg6: memref<384x128xbf16, #tpu.memory_space<vmem>>, %arg7: memref<1x128xf32, #tpu.memory_space<vmem>>, %arg8: memref<8x128xf32, #tpu.memory_space<vmem>>) attributes {dimension_semantics = [#tpu.dimension_semantics<parallel>], iteration_bounds = array<i64: 1>, scalar_prefetch = 0 : i64, scratch_operands = 0 : i64, tpu.core_type = #tpu.core_type<tc>, window_params = [{transform_indices = @transform_0, window_bounds = array<i64: 8, 16>}, {pipeline_mode = #tpu.pipeline_mode<synchronous>, transform_indices = @transform_1, window_bounds = array<i64: 16, 512>}, {pipeline_mode = #tpu.pipeline_mode<synchronous>, transform_indices = @transform_2, window_bounds = array<i64: 1, 512>}, {pipeline_mode = #tpu.pipeline_mode<synchronous>, transform_indices = @transform_3, window_bounds = array<i64: 512, 384>}, {pipeline_mode = #tpu.pipeline_mode<synchronous>, transform_indices = @transform_4, window_bounds = array<i64: 1, 384>}, {pipeline_mode = #tpu.pipeline_mode<synchronous>, transform_indices = @transform_5, window_bounds = array<i64: 384, 128>}, {pipeline_mode = #tpu.pipeline_mode<synchronous>, transform_indices = @transform_6, window_bounds = array<i64: 1, 128>}, {transform_indices = @transform_7, window_bounds = array<i64: 8, 128>}]} {
    %c0 = arith.constant 0 : index
    %c0_0 = arith.constant 0 : index
    %0 = vector.load %arg1[%c0, %c0_0] : memref<8x16xf32, #tpu.memory_space<vmem>>, vector<8x16xf32>
    %1 = arith.truncf %0 : vector<8x16xf32> to vector<8x16xbf16>
    %c0_1 = arith.constant 0 : index
    %c0_2 = arith.constant 0 : index
    %2 = vector.load %arg2[%c0_1, %c0_2] : memref<16x512xbf16, #tpu.memory_space<vmem>>, vector<16x512xbf16>
    %cst = arith.constant dense<0.000000e+00> : vector<8x512xf32>
    %3 = tpu.matmul %1, %2, %cst {dimension_numbers = #tpu.dot_dimension_numbers<[1], [0], [0], [1], [0, 0, 1, 1], [], []>} : vector<8x16xbf16>, vector<16x512xbf16>, vector<8x512xf32> -> vector<8x512xf32>
    %c0_3 = arith.constant 0 : index
    %c0_4 = arith.constant 0 : index
    %4 = vector.load %arg3[%c0_3, %c0_4] : memref<1x512xf32, #tpu.memory_space<vmem>>, vector<1x512xf32>
    %5 = vector.broadcast %4 : vector<1x512xf32> to vector<8x512xf32>
    %6 = arith.addf %3, %5 : vector<8x512xf32>
    %cst_5 = arith.constant 0.000000e+00 : f32
    %7 = vector.broadcast %cst_5 : f32 to vector<8x512xf32>
    %8 = arith.maximumf %6, %7 : vector<8x512xf32>
    %9 = arith.truncf %8 : vector<8x512xf32> to vector<8x512xbf16>
    %c0_6 = arith.constant 0 : index
    %c0_7 = arith.constant 0 : index
    %10 = vector.load %arg4[%c0_6, %c0_7] : memref<512x384xbf16, #tpu.memory_space<vmem>>, vector<512x384xbf16>
    %cst_8 = arith.constant dense<0.000000e+00> : vector<8x384xf32>
    %11 = tpu.matmul %9, %10, %cst_8 {dimension_numbers = #tpu.dot_dimension_numbers<[1], [0], [0], [1], [0, 0, 1, 1], [], []>} : vector<8x512xbf16>, vector<512x384xbf16>, vector<8x384xf32> -> vector<8x384xf32>
    %c0_9 = arith.constant 0 : index
    %c0_10 = arith.constant 0 : index
    %12 = vector.load %arg5[%c0_9, %c0_10] : memref<1x384xf32, #tpu.memory_space<vmem>>, vector<1x384xf32>
    %13 = vector.broadcast %12 : vector<1x384xf32> to vector<8x384xf32>
    %14 = arith.addf %11, %13 : vector<8x384xf32>
    %cst_11 = arith.constant 0.000000e+00 : f32
    %15 = vector.broadcast %cst_11 : f32 to vector<8x384xf32>
    %16 = arith.maximumf %14, %15 : vector<8x384xf32>
    %17 = arith.truncf %16 : vector<8x384xf32> to vector<8x384xbf16>
    %c0_12 = arith.constant 0 : index
    %c0_13 = arith.constant 0 : index
    %18 = vector.load %arg6[%c0_12, %c0_13] : memref<384x128xbf16, #tpu.memory_space<vmem>>, vector<384x128xbf16>
    %cst_14 = arith.constant dense<0.000000e+00> : vector<8x128xf32>
    %19 = tpu.matmul %17, %18, %cst_14 {dimension_numbers = #tpu.dot_dimension_numbers<[1], [0], [0], [1], [0, 0, 1, 1], [], []>} : vector<8x384xbf16>, vector<384x128xbf16>, vector<8x128xf32> -> vector<8x128xf32>
    %c0_15 = arith.constant 0 : index
    %c0_16 = arith.constant 0 : index
    %20 = vector.load %arg7[%c0_15, %c0_16] : memref<1x128xf32, #tpu.memory_space<vmem>>, vector<1x128xf32>
    %21 = vector.broadcast %20 : vector<1x128xf32> to vector<8x128xf32>
    %22 = arith.addf %19, %21 : vector<8x128xf32>
    %23 = math.tanh %22 : vector<8x128xf32>
    %cst_17 = arith.constant 2.000000e+00 : f32
    %24 = vector.broadcast %cst_17 : f32 to vector<8x128xf32>
    %25 = arith.mulf %24, %23 : vector<8x128xf32>
    %c0_18 = arith.constant 0 : index
    %c0_19 = arith.constant 0 : index
    %26 = vector.load %arg8[%c0_18, %c0_19] : memref<8x128xf32, #tpu.memory_space<vmem>>, vector<8x128xf32>
    tpu.vector_store %arg8[%c0_18, %c0_19], %25 {strides = array<i32>} : memref<8x128xf32, #tpu.memory_space<vmem>>, vector<8x128xf32>,
    return
  }
  func.func @transform_0(%arg0: i32) -> (i32, i32) {
    %c0_i32 = arith.constant 0 : i32
    %c0_i32_0 = arith.constant 0 : i32
    return %arg0, %c0_i32 : i32, i32
  }
  func.func @transform_1(%arg0: i32) -> (i32, i32) {
    %c0_i32 = arith.constant 0 : i32
    %c0_i32_0 = arith.constant 0 : i32
    %c0_i32_1 = arith.constant 0 : i32
    return %c0_i32, %c0_i32_0 : i32, i32
  }
  func.func @transform_2(%arg0: i32) -> (i32, i32) {
    %c0_i32 = arith.constant 0 : i32
    %c0_i32_0 = arith.constant 0 : i32
    %c0_i32_1 = arith.constant 0 : i32
    return %c0_i32, %c0_i32_0 : i32, i32
  }
  func.func @transform_3(%arg0: i32) -> (i32, i32) {
    %c0_i32 = arith.constant 0 : i32
    %c0_i32_0 = arith.constant 0 : i32
    %c0_i32_1 = arith.constant 0 : i32
    return %c0_i32, %c0_i32_0 : i32, i32
  }
  func.func @transform_4(%arg0: i32) -> (i32, i32) {
    %c0_i32 = arith.constant 0 : i32
    %c0_i32_0 = arith.constant 0 : i32
    %c0_i32_1 = arith.constant 0 : i32
    return %c0_i32, %c0_i32_0 : i32, i32
  }
  func.func @transform_5(%arg0: i32) -> (i32, i32) {
    %c0_i32 = arith.constant 0 : i32
    %c0_i32_0 = arith.constant 0 : i32
    %c0_i32_1 = arith.constant 0 : i32
    return %c0_i32, %c0_i32_0 : i32, i32
  }
  func.func @transform_6(%arg0: i32) -> (i32, i32) {
    %c0_i32 = arith.constant 0 : i32
    %c0_i32_0 = arith.constant 0 : i32
    %c0_i32_1 = arith.constant 0 : i32
    return %c0_i32, %c0_i32_0 : i32, i32
  }
  func.func @transform_7(%arg0: i32) -> (i32, i32) {
    %c0_i32 = arith.constant 0 : i32
    %c0_i32_0 = arith.constant 0 : i32
    return %arg0, %c0_i32 : i32, i32
  }
}

</mosaic_0001>

<bundles_post_ra>
// kernel: actor_ddpg_forward.1
= control target key start
LH: loop header
LB: loop body
LE: loop exit
PB: predicated region body
PF: predicated region fallthrough
CT: control target
= control target key end

     0   :  { %v1671_v1 = vmov 0   ;;  %vm75_vm0 = vcmask 130048   ;;  %v35_v57 = vlaneseq  ;;  %vm1673_vm1 = vmmov 0   ;;  %s2128_s1 = inlined_call_operand.vmem [shape: bf16[16,512], index: 1, kind: input, shape index: {}]   ;;  %s2129_s0 = inlined_call_operand.vmem [shape: f32[8,16], index: 0, kind: input, shape index: {}]   ;;  %s2130_s3 = inlined_call_operand.vmem [shape: bf16[512,384], index: 3, kind: input, shape index: {}]   ;;  %s2131_s2 = inlined_call_operand.vmem [shape: f32[1,512], index: 2, kind: input, shape index: {}]   ;;  %s2132_s5 = inlined_call_operand.vmem [shape: bf16[384,128], index: 5, kind: input, shape index: {}]   ;;  %s2133_s4 = inlined_call_operand.vmem [shape: f32[1,384], index: 4, kind: input, shape index: {}]   ;;  %s2134_s6 = inlined_call_operand.vmem [shape: f32[1,128], index: 6, kind: input, shape index: {}]   ;;  %s2135_s7 = inlined_call_operand.vmem [shape: f32[8,128], index: 7, kind: output, shape index: {}]  }
   0x1   :  { %v1511_v0 = vld [vmem:[%s2128_s1 + $0x4] ss:$16 sps:$4 sm:$0xff]   ;;  %111 = vmatprep.mubr.bf16.mxu0 %v1671_v1  ;;  %152 = vmatprep.mubr.bf16.mxu1 %v1671_v1  ;;  %v1513_v2 = vld [vmem:[%s2128_s1] ss:$16 sps:$4 sm:$0xff]   ;;  %v1514_v5 = vld [vmem:[%s2128_s1 + $0xc] ss:$16 sps:$4 sm:$0xff]  }
   0x2   :  { %v27_v3 = vld [vmem:[%s2129_s0] sm:$0xff]  ;;  %79 = vmatprep.subr.bf16.mxu0 %v1511_v0  ;;  %v1516_v6 = vld [vmem:[%s2128_s1 + $0x8] ss:$16 sps:$4 sm:$0xff]   ;;  %120 = vmatprep.subr.bf16.mxu1 %v1514_v5  ;;  %v1523_v12 = vld [vmem:[%s2130_s3 + $0x30] ss:$12 sps:$4 sm:$0xff]   ;;  %v1879_v58 = vshrl.u32 %v35_v57, 7 }
   0x3   :  { %v28_v4 = vpack.c.bf16 %v27_v3, %v27_v3  ;;  %80 = vmatpush1.bf16.msra.mxu0 %v1513_v2  ;;  %v1517_v7 = vld [vmem:[%s2130_s3] ss:$12 sps:$4 sm:$0xff]   ;;  %v1519_v8 = vld [vmem:[%s2130_s3 + $0x4] ss:$12 sps:$4 sm:$0xff]   ;;  %121 = vmatpush1.bf16.msra.mxu1 %v1516_v6  ;;  %v1522_v9 = vld [vmem:[%s2130_s3 + $0x1c] ss:$12 sps:$4 sm:$0xff]  }
   0x4   :  { %826 = vmatprep.subr.bf16.mxu0 %v1519_v8  ;;  %v1520_v10 = vld [vmem:[%s2130_s3 + $0x18] ss:$12 sps:$4 sm:$0xff]   ;;  %v1525_v11 = vld [vmem:[%s2130_s3 + $0x34] ss:$12 sps:$4 sm:$0xff]   ;;  %v1534_v19 = vld [vmem:[%s2130_s3 + $0x7c] ss:$12 sps:$4 sm:$0xff]  }
   0x5   :  { %v1528_v13 = vld [vmem:[%s2130_s3 + $0x4c] ss:$12 sps:$4 sm:$0xff]   ;;  %v1526_v14 = vld [vmem:[%s2130_s3 + $0x48] ss:$12 sps:$4 sm:$0xff]   ;;  %v1531_v15 = vld [vmem:[%s2130_s3 + $0x64] ss:$12 sps:$4 sm:$0xff]  }
   0x6   :  { %1284 = vmatmul.mubr.msk.bf16.vlgmr.msra.gmra.mrb[0].mxu0 %vm75_vm0, %v28_v4  ;;  %1285 = vmatmul.mubr.msk.bf16.vlgmr.msra.gmra.mrb[0].mxu1 %vm75_vm0, %v28_v4  ;;  %v1544_v16 = vld [vmem:[%s2130_s3 + $0xc8] ss:$12 sps:$4 sm:$0xff]   ;;  %v1529_v18 = vld [vmem:[%s2130_s3 + $0x60] ss:$12 sps:$4 sm:$0xff]   ;;  %v1532_v22 = vld [vmem:[%s2130_s3 + $0x78] ss:$12 sps:$4 sm:$0xff]  }
   0x7   :  { %827 = vmatpush1.bf16.msra.mxu0 %v1517_v7  ;;  %v1545_v17 = vld [vmem:[%s2130_s3 + $0x8] ss:$12 sps:$4 sm:$0xff]   ;;  %1407 = vmatprep.subr.bf16.mxu1 %v1544_v16  ;;  %v1549_v20 = vld [vmem:[%s2130_s3 + $0xe0] ss:$12 sps:$4 sm:$0xff]   ;;  %v1554_v23 = vld [vmem:[%s2130_s3 + $0xf8] ss:$12 sps:$4 sm:$0xff]  }
   0x8   :  { %828 = vmatprep.subr.bf16.mxu0 %v1522_v9  ;;  %1408 = vmatpush3.bf16.msra.mxu1 %v1545_v17  ;;  %v1550_v21 = vld [vmem:[%s2130_s3 + $0x20] ss:$12 sps:$4 sm:$0xff]   ;;  %v1555_v24 = vld [vmem:[%s2130_s3 + $0x38] ss:$12 sps:$4 sm:$0xff]   ;;  %v1559_v26 = vld [vmem:[%s2130_s3 + $0x110] ss:$12 sps:$4 sm:$0xff]  }
   0x9   :  { %1409 = vmatprep.subr.bf16.mxu1 %v1549_v20  ;;  %v1537_v25 = vld [vmem:[%s2130_s3 + $0x94] ss:$12 sps:$4 sm:$0xff]   ;;  %v1560_v27 = vld [vmem:[%s2130_s3 + $0x50] ss:$12 sps:$4 sm:$0xff]   ;;  %v1540_v29 = vld [vmem:[%s2130_s3 + $0xac] ss:$12 sps:$4 sm:$0xff]  }
   0xa   :  { %v1535_v28 = vld [vmem:[%s2130_s3 + $0x90] ss:$12 sps:$4 sm:$0xff]   ;;  %v1564_v30 = vld [vmem:[%s2130_s3 + $0x128] ss:$12 sps:$4 sm:$0xff]   ;;  %v1569_v34 = vld [vmem:[%s2130_s3 + $0x140] ss:$12 sps:$4 sm:$0xff]  }
   0xb   :  { %829 = vmatpush1.bf16.msra.mxu0 %v1520_v10  ;;  %v1565_v31 = vld [vmem:[%s2130_s3 + $0x68] ss:$12 sps:$4 sm:$0xff]   ;;  %v1543_v33 = vld [vmem:[%s2130_s3 + $0xc4] ss:$12 sps:$4 sm:$0xff]   ;;  %v1541_v35 = vld [vmem:[%s2130_s3 + $0xc0] ss:$12 sps:$4 sm:$0xff]  }
   0xc   :  { %830 = vmatprep.subr.bf16.mxu0 %v1525_v11  ;;  %1410 = vmatpush3.bf16.msra.mxu1 %v1550_v21  ;;  %v1538_v32 = vld [vmem:[%s2130_s3 + $0xa8] ss:$12 sps:$4 sm:$0xff]   ;;  %v1570_v36 = vld [vmem:[%s2130_s3 + $0x80] ss:$12 sps:$4 sm:$0xff]   ;;  %v1546_v38 = vld [vmem:[%s2130_s3 + $0xd8] ss:$12 sps:$4 sm:$0xff]  }
   0xd   :  { %1411 = vmatprep.subr.bf16.mxu1 %v1554_v23  ;;  %v1548_v37 = vld [vmem:[%s2130_s3 + $0xdc] ss:$12 sps:$4 sm:$0xff]   ;;  %v1553_v39 = vld [vmem:[%s2130_s3 + $0xf4] ss:$12 sps:$4 sm:$0xff]   ;;  %v1558_v41 = vld [vmem:[%s2130_s3 + $0x10c] ss:$12 sps:$4 sm:$0xff]  }
   0xe   :  { %v1551_v40 = vld [vmem:[%s2130_s3 + $0xf0] ss:$12 sps:$4 sm:$0xff]   ;;  %v1556_v42 = vld [vmem:[%s2130_s3 + $0x108] ss:$12 sps:$4 sm:$0xff]   ;;  %v1561_v44 = vld [vmem:[%s2130_s3 + $0x120] ss:$12 sps:$4 sm:$0xff]  }
   0xf   :  { %831 = vmatpush1.bf16.msra.mxu0 %v1523_v12  ;;  %v1563_v43 = vld [vmem:[%s2130_s3 + $0x124] ss:$12 sps:$4 sm:$0xff]   ;;  %v1568_v45 = vld [vmem:[%s2130_s3 + $0x13c] ss:$12 sps:$4 sm:$0xff]   ;;  %v1573_v47 = vld [vmem:[%s2130_s3 + $0x154] ss:$12 sps:$4 sm:$0xff]  }
  0x10   :  { %832 = vmatprep.subr.bf16.mxu0 %v1528_v13  ;;  %1412 = vmatpush3.bf16.msra.mxu1 %v1555_v24  ;;  %v1566_v46 = vld [vmem:[%s2130_s3 + $0x138] ss:$12 sps:$4 sm:$0xff]   ;;  %v1571_v49 = vld [vmem:[%s2130_s3 + $0x150] ss:$12 sps:$4 sm:$0xff]   ;;  %v1576_v53 = vld [vmem:[%s2130_s3 + $0x168] ss:$12 sps:$4 sm:$0xff]  }
  0x11   :  { %1413 = vmatprep.subr.bf16.mxu1 %v1559_v26  ;;  %v1574_v48 = vld [vmem:[%s2130_s3 + $0x158] ss:$12 sps:$4 sm:$0xff]   ;;  %v1579_v52 = vld [vmem:[%s2130_s3 + $0x170] ss:$12 sps:$4 sm:$0xff]   ;;  %v1584_v56 = vld [vmem:[%s2130_s3 + $0x248] ss:$12 sps:$4 sm:$0xff]  }
  0x12   :  { %v1575_v50 = vld [vmem:[%s2130_s3 + $0x98] ss:$12 sps:$4 sm:$0xff]   ;;  %v1580_v54 = vld [vmem:[%s2130_s3 + $0xb0] ss:$12 sps:$4 sm:$0xff]   ;;  %v37_v59 = vsub.s32 0, %v1879_v58  ;;  %v41_v61 = vsub.s32 1, %v1879_v58 }
  0x13   :  { %833 = vmatpush1.bf16.msra.mxu0 %v1526_v14  ;;  %v1578_v51 = vld [vmem:[%s2130_s3 + $0x16c] ss:$12 sps:$4 sm:$0xff]   ;;  %v1583_v55 = vld [vmem:[%s2130_s3 + $0x184] ss:$12 sps:$4 sm:$0xff]   ;;  %v1885_v60 = vld [vmem:[%s2131_s2] sm:$0xf] }
  0x14   :  { %834 = vmatprep.subr.bf16.mxu0 %v1531_v15  ;;  %1414 = vmatpush3.bf16.msra.mxu1 %v1560_v27  ;;  %v49_v62 = vsub.s32 3, %v1879_v58  ;;  %v38_v63 = vrot.slane %v1885_v60, %v37_v59  ;;  %v42_v0 = vrot.slane %v1885_v60, %v41_v61  ;;  %v1581_v16 = vld [vmem:[%s2130_s3 + $0x180] ss:$12 sps:$4 sm:$0xff]   ;;  %v1585_v17 = vld [vmem:[%s2130_s3 + $0x188] ss:$12 sps:$4 sm:$0xff]  }
  0x15   :  { %1415 = vmatprep.subr.bf16.mxu1 %v1564_v30  ;;  %v1588_v20 = vld [vmem:[%s2130_s3 + $0x19c] ss:$12 sps:$4 sm:$0xff]   ;;  %v1589_v21 = vld [vmem:[%s2130_s3 + $0x260] ss:$12 sps:$4 sm:$0xff]   ;;  %v1586_v23 = vld [vmem:[%s2130_s3 + $0x198] ss:$12 sps:$4 sm:$0xff]  }
  0x16   :  { %v50_v2 = vrot.slane %v1885_v60, %v49_v62  ;;  %v1590_v24 = vld [vmem:[%s2130_s3 + $0x1a0] ss:$12 sps:$4 sm:$0xff]   ;;  %v1594_v26 = vld [vmem:[%s2130_s3 + $0x278] ss:$12 sps:$4 sm:$0xff]   ;;  %v1591_v27 = vld [vmem:[%s2130_s3 + $0x1b0] ss:$12 sps:$4 sm:$0xff]  }
  0x17   :  { %835 = vmatpush1.bf16.msra.mxu0 %v1529_v18  ;;  %v1599_v30 = vld [vmem:[%s2130_s3 + $0x290] ss:$12 sps:$4 sm:$0xff]   ;;  %v1624_v57 = vld [vmem:[%s2130_s3 + $0x258] ss:$12 sps:$4 sm:$0xff]  }
  0x18   :  { %836 = vmatprep.subr.bf16.mxu0 %v1534_v19  ;;  %1416 = vmatpush3.bf16.msra.mxu1 %v1565_v31  ;;  %v1596_v31 = vld [vmem:[%s2130_s3 + $0x1c8] ss:$12 sps:$4 sm:$0xff]   ;;  %v1627_v62 = vld [vmem:[%s2130_s3 + $0x270] ss:$12 sps:$4 sm:$0xff]  }
  0x19   :  { %1417 = vmatprep.subr.bf16.mxu1 %v1569_v34  ;;  %v1604_v34 = vld [vmem:[%s2130_s3 + $0x2a8] ss:$12 sps:$4 sm:$0xff]  }
  0x1b   :  { %837 = vmatpush1.bf16.msra.mxu0 %v1532_v22 }
  0x1c   :  { %838 = vmatprep.subr.bf16.mxu0 %v1537_v25  ;;  %1418 = vmatpush3.bf16.msra.mxu1 %v1570_v36  ;;  %v1593_v25 = vld [vmem:[%s2130_s3 + $0x1b4] ss:$12 sps:$4 sm:$0xff]  }
  0x1d   :  { %1419 = vmatprep.subr.bf16.mxu1 %v1574_v48  ;;  %v1601_v36 = vld [vmem:[%s2130_s3 + $0x1e0] ss:$12 sps:$4 sm:$0xff]  }
  0x1e   :  { %v1618_v48 = vld [vmem:[%s2130_s3 + $0x22c] ss:$12 sps:$4 sm:$0xff]  }
  0x1f   :  { %839 = vmatpush1.bf16.msra.mxu0 %v1535_v28  ;;  %v1595_v28 = vld [vmem:[%s2130_s3 + $0x1b8] ss:$12 sps:$4 sm:$0xff]  }
  0x20   :  { %840 = vmatprep.subr.bf16.mxu0 %v1540_v29  ;;  %1420 = vmatpush3.bf16.msra.mxu1 %v1575_v50  ;;  %v1598_v29 = vld [vmem:[%s2130_s3 + $0x1cc] ss:$12 sps:$4 sm:$0xff]  }
  0x21   :  { %1421 = vmatprep.subr.bf16.mxu1 %v1579_v52  ;;  %v1620_v52 = vld [vmem:[%s2130_s3 + $0x230] ss:$12 sps:$4 sm:$0xff]  }
  0x23   :  { %841 = vmatpush1.bf16.msra.mxu0 %v1538_v32  ;;  %v1600_v32 = vld [vmem:[%s2130_s3 + $0x1d0] ss:$12 sps:$4 sm:$0xff]  }
  0x24   :  { %842 = vmatprep.subr.bf16.mxu0 %v1543_v33  ;;  %1422 = vmatpush3.bf16.msra.mxu1 %v1580_v54  ;;  %v1603_v33 = vld [vmem:[%s2130_s3 + $0x1e4] ss:$12 sps:$4 sm:$0xff]  }
  0x25   :  { %1429 = vmatprep.subr.bf16.mxu1 %v1584_v56  ;;  %v1626_v56 = vld [vmem:[%s2130_s3 + $0x25c] ss:$12 sps:$4 sm:$0xff]  }
  0x27   :  { %843 = vmatpush1.bf16.msra.mxu0 %v1541_v35  ;;  %v45_v35 = vsub.s32 2, %v1879_v58  ;;  %v1662_v58 = vld [vmem:[%s2132_s5 + $0x88] sm:$0xff]  }
  0x28   :  { %844 = vmatprep.subr.bf16.mxu0 %v1548_v37  ;;  %v1605_v37 = vld [vmem:[%s2130_s3 + $0x1e8] ss:$12 sps:$4 sm:$0xff]  }
  0x2b   :  { %845 = vmatpush1.bf16.msra.mxu0 %v1546_v38  ;;  %v1608_v38 = vld [vmem:[%s2130_s3 + $0x1fc] ss:$12 sps:$4 sm:$0xff]  }
  0x2c   :  { %846 = vmatprep.subr.bf16.mxu0 %v1553_v39  ;;  %v1609_v39 = vld [vmem:[%s2130_s3 + $0x2c0] ss:$12 sps:$4 sm:$0xff]  }
  0x2f   :  { %847 = vmatpush1.bf16.msra.mxu0 %v1551_v40  ;;  %v46_v40 = vrot.slane %v1885_v60, %v45_v35  ;;  %v1629_v60 = vld [vmem:[%s2130_s3 + $0x274] ss:$12 sps:$4 sm:$0xff]  }
  0x30   :  { %848 = vmatprep.subr.bf16.mxu0 %v1558_v41  ;;  %v1606_v41 = vld [vmem:[%s2130_s3 + $0x1f8] ss:$12 sps:$4 sm:$0xff]  }
  0x33   :  { %849 = vmatpush1.bf16.msra.mxu0 %v1556_v42  ;;  %v1610_v42 = vld [vmem:[%s2130_s3 + $0x200] ss:$12 sps:$4 sm:$0xff]  }
  0x34   :  { %850 = vmatprep.subr.bf16.mxu0 %v1563_v43  ;;  %v1613_v43 = vld [vmem:[%s2130_s3 + $0x214] ss:$12 sps:$4 sm:$0xff]  }
  0x37   :  { %851 = vmatpush1.bf16.msra.mxu0 %v1561_v44  ;;  %v1614_v44 = vld [vmem:[%s2130_s3 + $0x2d8] ss:$12 sps:$4 sm:$0xff]  }
  0x38   :  { %852 = vmatprep.subr.bf16.mxu0 %v1568_v45 }
  0x3b   :  { %853 = vmatpush1.bf16.msra.mxu0 %v1566_v46  ;;  %v1611_v46 = vld [vmem:[%s2130_s3 + $0x210] ss:$12 sps:$4 sm:$0xff]  }
  0x3c   :  { %854 = vmatprep.subr.bf16.mxu0 %v1573_v47  ;;  %v1615_v47 = vld [vmem:[%s2130_s3 + $0x218] ss:$12 sps:$4 sm:$0xff]  }
  0x3f   :  { %855 = vmatpush1.bf16.msra.mxu0 %v1571_v49  ;;  %v1619_v49 = vld [vmem:[%s2130_s3 + $0x2f0] ss:$12 sps:$4 sm:$0xff]  }
  0x40   :  { %856 = vmatprep.subr.bf16.mxu0 %v1578_v51  ;;  %v1616_v51 = vld [vmem:[%s2130_s3 + $0x228] ss:$12 sps:$4 sm:$0xff]  }
  0x43   :  { %857 = vmatpush1.bf16.msra.mxu0 %v1576_v53  ;;  %v1623_v53 = vld [vmem:[%s2130_s3 + $0x244] ss:$12 sps:$4 sm:$0xff]  }
  0x44   :  { %867 = vmatprep.subr.bf16.mxu0 %v1583_v55  ;;  %v1621_v55 = vld [vmem:[%s2130_s3 + $0x240] ss:$12 sps:$4 sm:$0xff]  }
  0xd9   :  { %v113_v1 = vpop.f32.mrb[0].mxu0  ;;  %v1896_v7 = vpop.f32.mrb[0].mxu1 }
  0xda   :  { %v114_v3 = vadd.f32 %v113_v1, %v38_v63  ;;  %v115_v4 = vpop.f32.mrb[1].mxu0  ;;  %v156_v10 = vpop.f32.mrb[1].mxu1  ;;  %v155_v45 = vadd.f32 %v1896_v7, %v46_v40  ;;  %v1632_v63 = vld [vmem:[%s2130_s3 + $0x28c] ss:$12 sps:$4 sm:$0xff]   ;;  %v1635_v1 = vld [vmem:[%s2130_s3 + $0x2a4] ss:$12 sps:$4 sm:$0xff]  }
  0xdb   :  { %v116_v5 = vadd.f32 %v115_v4, %v42_v0  ;;  %v117_v6 = vpop.f32.mrb[2].mxu0  ;;  %v157_v12 = vadd.f32 %v156_v10, %v50_v2  ;;  %v158_v13 = vpop.f32.mrb[2].mxu1  ;;  %v1630_v0 = vld [vmem:[%s2130_s3 + $0x288] ss:$12 sps:$4 sm:$0xff]   ;;  %v1633_v2 = vld [vmem:[%s2130_s3 + $0x2a0] ss:$12 sps:$4 sm:$0xff]  }
  0xdc   :  { %v161_v8 = vmax.f32 %v114_v3, 0.0  ;;  %v118_v9 = vpop.f32.mrb[3].mxu0  ;;  %v159_v14 = vpop.f32.mrb[3].mxu1  ;;  %v163_v50 = vmax.f32 %v155_v45, 0.0  ;;  %v1638_v3 = vld [vmem:[%s2130_s3 + $0x2bc] ss:$12 sps:$4 sm:$0xff]  }
  0xdd   :  { %v162_v11 = vmax.f32 %v116_v5, 0.0  ;;  %v164_v18 = vmax.f32 %v157_v12, 0.0  ;;  %v1636_v4 = vld [vmem:[%s2130_s3 + $0x2b8] ss:$12 sps:$4 sm:$0xff]   ;;  %v1641_v5 = vld [vmem:[%s2130_s3 + $0x2d4] ss:$12 sps:$4 sm:$0xff]  }
  0xde   :  { %v165_v19 = vpack.c.bf16 %v161_v8, %v161_v8  ;;  %v167_v54 = vpack.c.bf16 %v163_v50, %v163_v50  ;;  %v1639_v6 = vld [vmem:[%s2130_s3 + $0x2d0] ss:$12 sps:$4 sm:$0xff]   ;;  %v1644_v7 = vld [vmem:[%s2130_s3 + $0x2ec] ss:$12 sps:$4 sm:$0xff]   ;;  %v1642_v8 = vld [vmem:[%s2130_s3 + $0x2e8] ss:$12 sps:$4 sm:$0xff]  }
  0xdf   :  { %v166_v15 = vpack.c.bf16 %v162_v11, %v162_v11  ;;  %v168_v22 = vpack.c.bf16 %v164_v18, %v164_v18  ;;  %v1645_v9 = vld [vmem:[%s2132_s5 + $0x40] sm:$0xff]   ;;  %v1647_v11 = vld [vmem:[%s2132_s5 + $0x48] sm:$0xff]   ;;  %v1649_v13 = vld [vmem:[%s2132_s5 + $0x50] sm:$0xff]  }
  0xe0   :  { %v1646_v10 = vld [vmem:[%s2132_s5] sm:$0xff]   ;;  %v1648_v12 = vld [vmem:[%s2132_s5 + $0x8] sm:$0xff]   ;;  %v1650_v14 = vld [vmem:[%s2132_s5 + $0x10] sm:$0xff]  }
  0xe1   :  { %858 = vmatprep.mubr.bf16.mxu0 %v166_v15  ;;  %940 = vmatprep.mubr.bf16.mxu1 %v166_v15  ;;  %v1651_v15 = vld [vmem:[%s2132_s5 + $0x58] sm:$0xff]   ;;  %v1654_v18 = vld [vmem:[%s2132_s5 + $0x20] sm:$0xff]  }
  0xe2   :  { %859 = vmatmul.mubr.bf16.vlgmr.msra.gmra.mrb[4].mxu0 %v165_v19  ;;  %941 = vmatmul.mubr.bf16.vlgmr.msra.gmra.mrb[4].mxu1 %v165_v19  ;;  %v1655_v19 = vld [vmem:[%s2132_s5 + $0x68] sm:$0xff]  }
  0xe3   :  { %868 = vmatpush1.bf16.msra.mxu0 %v1581_v16  ;;  %1430 = vmatpush3.bf16.msra.mxu1 %v1585_v17  ;;  %v1652_v16 = vld [vmem:[%s2132_s5 + $0x18] sm:$0xff]   ;;  %v1653_v17 = vld [vmem:[%s2132_s5 + $0x60] sm:$0xff]  }
  0xe4   :  { %869 = vmatprep.subr.bf16.mxu0 %v1588_v20  ;;  %1431 = vmatprep.subr.bf16.mxu1 %v1589_v21  ;;  %v1656_v20 = vld [vmem:[%s2132_s5 + $0x28] sm:$0xff]   ;;  %v1657_v21 = vld [vmem:[%s2132_s5 + $0x70] sm:$0xff]  }
  0xe5   :  { %980 = vmatprep.mubr.bf16.mxu1 %v168_v22  ;;  %899 = vmatprep.mubr.bf16.mxu0 %v168_v22  ;;  %v1658_v22 = vld [vmem:[%s2132_s5 + $0x30] sm:$0xff]  }
  0xe7   :  { %870 = vmatpush1.bf16.msra.mxu0 %v1586_v23  ;;  %1432 = vmatpush3.bf16.msra.mxu1 %v1590_v24  ;;  %v1659_v23 = vld [vmem:[%s2132_s5 + $0x78] sm:$0xff]  }
  0xe8   :  { %871 = vmatprep.subr.bf16.mxu0 %v1593_v25  ;;  %1433 = vmatprep.subr.bf16.mxu1 %v1594_v26  ;;  %v1660_v24 = vld [vmem:[%s2132_s5 + $0x38] sm:$0xff]   ;;  %v1672_v25 = vmov 0.0  }
  0xeb   :  { %872 = vmatpush1.bf16.msra.mxu0 %v1591_v27  ;;  %1434 = vmatpush3.bf16.msra.mxu1 %v1595_v28 }
  0xec   :  { %873 = vmatprep.subr.bf16.mxu0 %v1598_v29  ;;  %1435 = vmatprep.subr.bf16.mxu1 %v1599_v30 }
  0xef   :  { %874 = vmatpush1.bf16.msra.mxu0 %v1596_v31  ;;  %1436 = vmatpush3.bf16.msra.mxu1 %v1600_v32  ;;  %v297_v31 = vld [vmem:[%s2133_s4] sm:$0x7] }
  0xf0   :  { %875 = vmatprep.subr.bf16.mxu0 %v1603_v33  ;;  %1437 = vmatprep.subr.bf16.mxu1 %v1604_v34  ;;  %v310_v32 = vrot.slane %v297_v31, %v45_v35 }
  0xf3   :  { %876 = vmatpush1.bf16.msra.mxu0 %v1601_v36  ;;  %1438 = vmatpush3.bf16.msra.mxu1 %v1605_v37 }
  0xf4   :  { %877 = vmatprep.subr.bf16.mxu0 %v1608_v38  ;;  %1439 = vmatprep.subr.bf16.mxu1 %v1609_v39 }
  0xf7   :  { %878 = vmatpush1.bf16.msra.mxu0 %v1606_v41  ;;  %1440 = vmatpush3.bf16.msra.mxu1 %v1610_v42  ;;  %v302_v41 = vrot.slane %v297_v31, %v37_v59  ;;  %v306_v42 = vrot.slane %v297_v31, %v41_v61  ;;  %v1663_v59 = vld [vmem:[%s2132_s5 + $0x90] sm:$0xff]   ;;  %v1664_v61 = vld [vmem:[%s2132_s5 + $0x98] sm:$0xff]  }
  0xf8   :  { %879 = vmatprep.subr.bf16.mxu0 %v1613_v43  ;;  %1441 = vmatprep.subr.bf16.mxu1 %v1614_v44 }
  0xfb   :  { %880 = vmatpush1.bf16.msra.mxu0 %v1611_v46  ;;  %1442 = vmatpush3.bf16.msra.mxu1 %v1615_v47 }
  0xfc   :  { %881 = vmatprep.subr.bf16.mxu0 %v1618_v48  ;;  %1443 = vmatprep.subr.bf16.mxu1 %v1619_v49 }
  0xff   :  { %882 = vmatpush1.bf16.msra.mxu0 %v1616_v51  ;;  %1444 = vmatpush3.bf16.msra.mxu1 %v1620_v52  ;;  %v1661_v51 = vld [vmem:[%s2132_s5 + $0x80] sm:$0xff]  }
 0x100   :  { %883 = vmatprep.subr.bf16.mxu0 %v1623_v53  ;;  %1451 = vmatprep.subr.bf16.mxu1 %v1645_v9  ;;  %v1665_v53 = vld [vmem:[%s2132_s5 + $0xa0] sm:$0xff]  }
 0x102   :  { %981 = vmatmul.mubr.bf16.vlgmr.msra.gmra.mrb[8].mxu1 %v167_v54 }
 0x103   :  { %884 = vmatpush1.bf16.msra.mxu0 %v1621_v55  ;;  %1452 = vmatpush3.bf16.msra.mxu1 %v1646_v10  ;;  %v1667_v55 = vld [vmem:[%s2132_s5 + $0xb0] sm:$0xff]  }
 0x104   :  { %885 = vmatprep.subr.bf16.mxu0 %v1626_v56  ;;  %1453 = vmatprep.subr.bf16.mxu1 %v1647_v11  ;;  %v1668_v56 = vld [vmem:[%s2132_s5 + $0xb8] sm:$0xff]  }
 0x107   :  { %886 = vmatpush1.bf16.msra.mxu0 %v1624_v57  ;;  %1454 = vmatpush3.bf16.msra.mxu1 %v1648_v12 }
 0x108   :  { %887 = vmatprep.subr.bf16.mxu0 %v1629_v60  ;;  %1455 = vmatprep.subr.bf16.mxu1 %v1649_v13 }
 0x10b   :  { %888 = vmatpush1.bf16.msra.mxu0 %v1627_v62  ;;  %1456 = vmatpush3.bf16.msra.mxu1 %v1650_v14 }
 0x10c   :  { %889 = vmatprep.subr.bf16.mxu0 %v1632_v63  ;;  %1457 = vmatprep.subr.bf16.mxu1 %v1651_v15 }
 0x10f   :  { %890 = vmatpush1.bf16.msra.mxu0 %v1630_v0  ;;  %1458 = vmatpush3.bf16.msra.mxu1 %v1652_v16 }
 0x110   :  { %891 = vmatprep.subr.bf16.mxu0 %v1635_v1  ;;  %1459 = vmatprep.subr.bf16.mxu1 %v1653_v17 }
 0x113   :  { %892 = vmatpush1.bf16.msra.mxu0 %v1633_v2  ;;  %1460 = vmatpush3.bf16.msra.mxu1 %v1654_v18 }
 0x114   :  { %893 = vmatprep.subr.bf16.mxu0 %v1638_v3  ;;  %1461 = vmatprep.subr.bf16.mxu1 %v1655_v19  ;;  %v1382_v3 = vld [vmem:[%s2134_s6] ss:$0 sm:$0xff] }
 0x117   :  { %894 = vmatpush1.bf16.msra.mxu0 %v1636_v4  ;;  %1462 = vmatpush3.bf16.msra.mxu1 %v1656_v20 }
 0x118   :  { %895 = vmatprep.subr.bf16.mxu0 %v1641_v5  ;;  %1463 = vmatprep.subr.bf16.mxu1 %v1657_v21 }
 0x11b   :  { %896 = vmatpush1.bf16.msra.mxu0 %v1639_v6  ;;  %1464 = vmatpush3.bf16.msra.mxu1 %v1658_v22 }
 0x11c   :  { %897 = vmatprep.subr.bf16.mxu0 %v1644_v7  ;;  %1465 = vmatprep.subr.bf16.mxu1 %v1659_v23 }
 0x11f   :  { %898 = vmatpush1.bf16.msra.mxu0 %v1642_v8  ;;  %1466 = vmatpush3.bf16.msra.mxu1 %v1660_v24 }
 0x120   :  { %1482 = vmatprep.subr.bf16.mxu1 %v1672_v25 }
 0x122   :  { %900 = vmatmul.mubr.bf16.vlgmr.msra.gmra.mrb[4].mxu0 %v167_v54  ;;  %v1666_v54 = vld [vmem:[%s2132_s5 + $0xa8] sm:$0xff]  }
 0x1b5   :  { %v1423_v26 = vpop.f32.mrb[4].mxu1 }
 0x1b6   :  { %v1424_v27 = vpop.f32.mrb[5].mxu1 }
 0x1b7   :  { %v1425_v28 = vadd.f32 %v1424_v27, %v1423_v26  ;;  %v1426_v29 = vpop.f32.mrb[6].mxu1 }
 0x1b8   :  { %v1427_v30 = vpop.f32.mrb[7].mxu1 }
 0x1b9   :  { %v943_v36 = vadd.f32 %v1425_v28, %v310_v32 }
 0x1d5   :  { %v1445_v33 = vpop.f32.mrb[8].mxu1 }
 0x1d6   :  { %v1446_v34 = vpop.f32.mrb[9].mxu1 }
 0x1d7   :  { %v1447_v37 = vadd.f32 %v1446_v34, %v1445_v33  ;;  %v1448_v38 = vpop.f32.mrb[10].mxu1 }
 0x1d8   :  { %v1449_v39 = vpop.f32.mrb[11].mxu1 }
 0x1d9   :  { %v983_v40 = vadd.f32 %v1447_v37, %v943_v36 }
 0x1db   :  { %v990_v57 = vmax.f32 %v983_v40, 0.0 }
 0x1dd   :  { %v993_v60 = vpack.c.bf16 %v990_v57, %v990_v57 }
 0x1f5   :  { %v901_v43 = vpop.f32.mrb[4].mxu0 }
 0x1f6   :  { %v1502_v44 = vadd.f32 %v901_v43, %v302_v41  ;;  %v903_v45 = vpop.f32.mrb[5].mxu0 }
 0x1f7   :  { %v1503_v46 = vadd.f32 %v903_v45, %v306_v42  ;;  %v905_v47 = vpop.f32.mrb[6].mxu0 }
 0x1f8   :  { %v988_v48 = vmax.f32 %v1502_v44, 0.0  ;;  %v906_v35 = vpop.f32.mrb[7].mxu0 }
 0x1f9   :  { %v989_v49 = vmax.f32 %v1503_v46, 0.0 }
 0x1fa   :  { %v991_v52 = vpack.c.bf16 %v988_v48, %v988_v48 }
 0x1fb   :  { %v992_v50 = vpack.c.bf16 %v989_v49, %v989_v49 }
 0x1fd   :  { %1225 = vmatprep.mubr.bf16.mxu1 %v992_v50 }
 0x1fe   :  { %1226 = vmatmul.mubr.bf16.vlgmr.msra.gmra.mrb[12].mxu1 %v991_v52 }
 0x1ff   :  { %1483 = vmatpush3.bf16.msra.mxu1 %v1661_v51  ;;  %1498 = vmatprep.mubr.msk.bf16.mxu1 %vm1673_vm1, %v1672_v25 }
 0x200   :  { %1484 = vmatprep.subr.bf16.mxu1 %v1672_v25 }
 0x203   :  { %1485 = vmatpush3.bf16.msra.mxu1 %v1662_v58 }
 0x204   :  { %1486 = vmatprep.subr.bf16.mxu1 %v1672_v25 }
 0x207   :  { %1487 = vmatpush3.bf16.msra.mxu1 %v1663_v59 }
 0x208   :  { %1488 = vmatprep.subr.bf16.mxu1 %v1672_v25 }
 0x20b   :  { %1489 = vmatpush3.bf16.msra.mxu1 %v1664_v61 }
 0x20c   :  { %1490 = vmatprep.subr.bf16.mxu1 %v1672_v25 }
 0x20f   :  { %1491 = vmatpush3.bf16.msra.mxu1 %v1665_v53 }
 0x210   :  { %1492 = vmatprep.subr.bf16.mxu1 %v1672_v25 }
 0x213   :  { %1493 = vmatpush3.bf16.msra.mxu1 %v1666_v54 }
 0x214   :  { %1494 = vmatprep.subr.bf16.mxu1 %v1672_v25 }
 0x217   :  { %1495 = vmatpush3.bf16.msra.mxu1 %v1667_v55 }
 0x218   :  { %1496 = vmatprep.subr.bf16.mxu1 %v1672_v25 }
 0x21b   :  { %1497 = vmatpush3.bf16.msra.mxu1 %v1668_v56 }
 0x21e   :  { %1499 = vmatmul.mubr.bf16.vlgmr.msra.gmra.mrb[16].mxu1 %v993_v60 }
 0x2d1   :  { %v1467_v62 = vpop.f32.mrb[12].mxu1 }
 0x2d2   :  { %v1468_v63 = vpop.f32.mrb[13].mxu1 }
 0x2d3   :  { %v1469_v0 = vadd.f32 %v1468_v63, %v1467_v62  ;;  %v1470_v1 = vpop.f32.mrb[14].mxu1 }
 0x2d4   :  { %v1471_v2 = vpop.f32.mrb[15].mxu1 }
 0x2d5   :  { %v1228_v4 = vadd.f32 %v1469_v0, %v1382_v3 }
 0x2f1   :  { %v1267_v5 = vpop.f32.mrb[16].mxu1 }
 0x2f2   :  { %v1268_v6 = vadd.f32 %v1267_v5, %v1228_v4  ;;  %v1500_v7 = vpop.f32.mrb[17].mxu1 }
 0x2f3   :  { %v1270_v8 = vpop.f32.mrb[18].mxu1 }
 0x2f4   :  { %1669 = vtanh.f32 %v1268_v6  ;;  %v1501_v9 = vpop.f32.mrb[19].mxu1 }
 0x2fe   :  { %v1670_v10 = vpop.eup %1669 }
 0x2ff   :  { %v1274_v11 = vmul.f32 2.0, %v1670_v10 }
 0x301   :  { %1275 = vst [vmem:[%s2135_s7] sm:$0xff] %v1274_v11 }

</bundles_post_ra>
